<compile_context>
chip_gen: v7x
topology: tpu7x:2x2x1
jax: 0.10.0
libtpu: 0.0.40
codegen_flags: <defaults>
</compile_context>

<pallas_src>
import jax
import jax.numpy as jnp
from jax.experimental import pallas as pl
from jax.experimental.pallas import tpu as pltpu


def _touch_kernel(x_ref, o_ref):
    # Single-vreg pass-through: the minimal real Mosaic kernel possible here,
    # since DummyModule.forward contains no math at all.
    o_ref[...] = x_ref[...]


def pallas_device_smoke_test(x):
    """Copy exactly one lane-dense tile of x through a Pallas kernel.

    Optional device-path smoke test only — DummyModule.forward is
    metadata-only, so nothing produced here feeds the module's output.
    """
    n = x.shape[0]
    x2d = x.reshape(n, -1)            # (N, C*H*W); last dim is lane axis
    f = x2d.shape[1]
    # Block dims must be divisible by (8, 128) OR equal the full array dims.
    rows = 8 if n >= 8 else n         # N=2 < 8  -> full dim (allowed)
    cols = 128 if f >= 128 else f     # 128-wide -> unmasked vst stores
    return pl.pallas_call(
        _touch_kernel,
        out_shape=jax.ShapeDtypeStruct((rows, cols), x2d.dtype),
        grid_spec=pltpu.PrefetchScalarGridSpec(
            num_scalar_prefetch=0,
            grid=(1,),
            # Only the first (rows, cols) tile of x2d is ever DMA'd.
            in_specs=[pl.BlockSpec((rows, cols), lambda i: (0, 0))],
            out_specs=pl.BlockSpec((rows, cols), lambda i: (0, 0)),
        ),
        compiler_params=pltpu.CompilerParams(
            dimension_semantics=("arbitrary",)),
    )(x2d)


def dummy_module_forward(x):
    """JAX equivalent of DummyModule.forward.

    x: NCHW array of shape (N, C, H, W), any dtype.
    returns: zero-element array of shape (N, 0, 7, 7) with x's dtype.
    """
    n = x.shape[0]
    # TODO(synk): a zero-element (N, 0, 7, 7) output cannot be expressed as a
    # pallas_call output (nothing to tile / DMA); it is plain JAX metadata.
    return jnp.zeros((n, 0, 7, 7), dtype=x.dtype)


if __name__ == "__main__":
    key = jax.random.PRNGKey(0)
    # Small NCHW input consistent with the module's expected image input.
    x = jax.random.normal(key, (2, 4, 16, 16), dtype=jnp.float32)

    # Run the Pallas smoke-test kernel once and verify the tile it copied.
    tile = jax.block_until_ready(pallas_device_smoke_test(x))
    ref_tile = x.reshape(x.shape[0], -1)[: tile.shape[0], : tile.shape[1]]
    assert tile.shape == (2, 128), tile.shape
    assert jnp.array_equal(tile, ref_tile), "smoke-test tile mismatch"

    # The actual module forward: metadata-only zero-element output.
    out = jax.block_until_ready(dummy_module_forward(x))
    assert out.shape == (2, 0, 7, 7), out.shape
    assert out.dtype == x.dtype, out.dtype
    print("KERNEL_OK")
</pallas_src>

<mosaic_0001>
module attributes {stable_mosaic.version = 11 : i64} {
  func.func @_touch_kernel(%arg0: i32, %arg1: memref<2x128xf32, #tpu.memory_space<vmem>>, %arg2: memref<2x128xf32, #tpu.memory_space<vmem>>) attributes {dimension_semantics = [#tpu.dimension_semantics<arbitrary>], iteration_bounds = array<i64: 1>, scalar_prefetch = 0 : i64, scratch_operands = 0 : i64, tpu.core_type = #tpu.core_type<tc>, window_params = [{transform_indices = @transform_0, window_bounds = array<i64: 2, 128>}, {pipeline_mode = #tpu.pipeline_mode<synchronous>, transform_indices = @transform_1, window_bounds = array<i64: 2, 128>}]} {
    %c0 = arith.constant 0 : index
    %c0_0 = arith.constant 0 : index
    %0 = vector.load %arg1[%c0, %c0_0] : memref<2x128xf32, #tpu.memory_space<vmem>>, vector<2x128xf32>
    %c0_1 = arith.constant 0 : index
    %c0_2 = arith.constant 0 : index
    %1 = vector.load %arg2[%c0_1, %c0_2] : memref<2x128xf32, #tpu.memory_space<vmem>>, vector<2x128xf32>
    tpu.vector_store %arg2[%c0_1, %c0_2], %0 {strides = array<i32>} : memref<2x128xf32, #tpu.memory_space<vmem>>, vector<2x128xf32>,
    return
  }
  func.func @transform_0(%arg0: i32) -> (i32, i32) {
    %c0_i32 = arith.constant 0 : i32
    %c0_i32_0 = arith.constant 0 : i32
    %c0_i32_1 = arith.constant 0 : i32
    return %c0_i32, %c0_i32_0 : i32, i32
  }
  func.func @transform_1(%arg0: i32) -> (i32, i32) {
    %c0_i32 = arith.constant 0 : i32
    %c0_i32_0 = arith.constant 0 : i32
    %c0_i32_1 = arith.constant 0 : i32
    return %c0_i32, %c0_i32_0 : i32, i32
  }
}

</mosaic_0001>

<bundles_post_ra>
// kernel: tpu_custom_call.1
= control target key start
LH: loop header
LB: loop body
LE: loop exit
PB: predicated region body
PF: predicated region fallthrough
CT: control target
= control target key end

     0   :  { %6 = vsyncpa [#allocation3], 0  ;;  %s127_s0 = inlined_call_operand.hbm [shape: f32[2,1024], index: 0, kind: input, shape index: {}]   ;;  %s128_s1 = inlined_call_operand.hbm [shape: f32[2,128], index: 1, kind: output, shape index: {}]  }
   0x1   :  { %7 = vsyncpa [#allocation4], 0  ;;  %s88_s6 = smov [#allocation2]   ;;  %s40_s10 = scalar_lea.hbm %s127_s0, 32 }
   0x2   :  { %s14_s7 = sshll.u32 %s88_s6, 4  ;;  %p41_p0 = scmp.ne.s32.totalorder %s127_s0, %s40_s10  ;;  %s15_s7 = int_to_ptr.vmem [resolvable:$true] %s14_s7 }
   0x3   :  { %s42_s15 = scalar_lea.hbm %s127_s0, 256  ;;  %p44_p2 = scmp.lt.u32.totalorder %s40_s10, %s127_s0 }
   0x4   :  { %p43_p1 = scmp.lt.u32.totalorder %s42_s15, %s40_s10 }
   0x6   :  { %p45_p3 = por %p44_p2, %p43_p1 }
   0x8   :  { %p46_p4 = pnand %p45_p3, %p41_p0 }
   0xa   :  { %49 = shalt.err (!%p46_p4)
}
   0xb   :  { %s50_s18 = scalar_lea.vmem %s15_s7, 32  ;;  %p55_p6 = scmp.lt.s32.totalorder %s15_s7, %s15_s7 }
   0xc   :  { %p51_p5 = scmp.ne.s32.totalorder %s15_s7, %s50_s18  ;;  %p56_p7 = scmp.lt.s32.totalorder %s50_s18, %s50_s18 }
   0xe   :  { %p57_p8 = por %p56_p7, %p55_p6 }
  0x10   :  { %p58_p9 = pnand %p57_p8, %p51_p5 }
  0x12   :  { %61 = shalt.err (!%p58_p9)
}
  0x13   :  { %17 = dma.hbm_to_vmem [thread:$0]  %s127_s0, 32, %s15_s7, [#allocation3]  }
  0x14   :  { %84 = dma.done.wait [#allocation3], 32  }
  0x15   :  { %85 = vsyncadd [#allocation3], 4294967264  ;;  %s89_s21 = smov [#allocation5]   ;;  %v21_v0 = vld [vmem:[#allocation2] sm:$0x3] }
  0x16   :  { %s29_s22 = sshll.u32 %s89_s21, 4  ;;  %22 = vst [vmem:[#allocation5] sm:$0x3] %v21_v0  ;;  %s30_s22 = int_to_ptr.vmem [resolvable:$true] %s29_s22 }
  0x17   :  { %s62_s23 = scalar_lea.vmem %s30_s22, 32  ;;  %p67_p11 = scmp.lt.s32.totalorder %s30_s22, %s30_s22 }
  0x18   :  { %p63_p10 = scmp.ne.s32.totalorder %s30_s22, %s62_s23  ;;  %p68_p12 = scmp.lt.s32.totalorder %s62_s23, %s62_s23 }
  0x1a   :  { %p69_p13 = por %p68_p12, %p67_p11 }
  0x1c   :  { %p70_p0 = pnand %p69_p13, %p63_p10 }
  0x1e   :  { %73 = shalt.err (!%p70_p0)
}
  0x1f   :  { %s74_s26 = scalar_lea.hbm %s128_s1, 32 }
  0x20   :  { %p75_p1 = scmp.ne.s32.totalorder %s128_s1, %s74_s26  ;;  %p78_p2 = scmp.lt.u32.totalorder %s74_s26, %s128_s1 }
  0x22   :  { %p80_p3 = pnand %p78_p2, %p75_p1 }
  0x24   :  { %83 = shalt.err (!%p80_p3)
}
  0x25   :  { %32 = dma.vmem_to_hbm [thread:$0]  %s30_s22, 32, %s128_s1, [#allocation4]  }
  0x26   :  { %86 = dma.done.wait [#allocation4], 32  }
  0x27   :  { %87 = vsyncadd [#allocation4], 4294967264 }
  0x28   :  { %36 = vsyncpa [#allocation3], 1 }
  0x29   :  { %37 = vsyncpa [#allocation4], 1 }

</bundles_post_ra>
